<compile_context>
chip_gen: v5e
topology: v5e:2x2
jax: 0.10.0
libtpu: 0.0.40
codegen_flags: <defaults>
</compile_context>

<pallas_src>
import functools
import math

import jax
import jax.numpy as jnp
import numpy as np
from jax.experimental import pallas as pl
from jax.experimental.pallas import tpu as pltpu


# ----------------------------------------------------------------------------
# verbatim numpy port of bsm() (mask built host-side, once, at trace time)
# ----------------------------------------------------------------------------
def _bsm_np(n, d):
    a = [[0] * n for _ in range(n)]
    p, q = 0, n - 1
    w = int((n + 1) / 2)
    t = 0
    while p < d:
        for i in range(p, q):
            a[p][i] = t
        for i in range(p, q):
            a[i][q] = t
        for i in range(q, p, -1):
            a[q][i] = t
        for i in range(q, p, -1):
            a[i][p] = t
        p += 1
        q -= 1
    while p == d or (p > d and p < q):
        for i in range(p, q):
            a[p][i] = 1
        for i in range(p, q):
            a[i][q] = 1
        for i in range(q, p, -1):
            a[q][i] = 1
        for i in range(q, p, -1):
            a[i][p] = 1
        a[w - 1][w - 1] = 1
        p += 1
        q -= 1
    return np.array(a)


# ----------------------------------------------------------------------------
# K1: both pooled means via one MXU matmul against a resident (HWp, 2) matrix
# ----------------------------------------------------------------------------
def _pool_kernel(x_ref, red_ref, means_ref):
    x = x_ref[...].astype(jnp.float32)               # (TR, HWp)
    means_ref[...] = jnp.dot(x, red_ref[...],        # (HWp, 2) resident
                             preferred_element_type=jnp.float32)


# ----------------------------------------------------------------------------
# K3: out = x * at  (lane-dense, row-tiled, native-dtype multiply)
# ----------------------------------------------------------------------------
def _scale_kernel(x_ref, at_ref, o_ref):
    x = x_ref[...]                                   # (TR, HWp), native dtype
    at = at_ref[...].astype(x.dtype)                 # (TR, 1) lane-broadcast
    o_ref[...] = (x * at).astype(o_ref.dtype)


# ----------------------------------------------------------------------------
# tiling plan: dtype-aware sublane alignment, padded rows (never tiny tiles),
# decoupled pool/scale tile sizes, >=2 grid steps when the input is big
# ----------------------------------------------------------------------------
def _plan_tiles(rows, row_bytes, sub, scale_target=4 << 20, pool_target=8 << 20):
    rows_a = -(-rows // sub) * sub                   # sublane-align row count
    cap3 = max(sub, (scale_target // max(1, row_bytes)) // sub * sub)
    if rows_a <= cap3:
        # single block fits; split in two (megacore) only when big enough
        if rows_a >= 2 * sub and rows_a * row_bytes > (1 << 20):
            tr3 = -(-(rows_a // 2) // sub) * sub
        else:
            tr3 = rows_a
    else:
        tr3 = cap3
    rp = -(-rows_a // tr3) * tr3                     # pad rows, never shrink tile
    n3 = rp // tr3
    # pool kernel streams only one big input -> group several scale tiles,
    # but keep >= 2 grid steps when possible (v7x megacore)
    cap1 = max(1, pool_target // max(1, tr3 * row_bytes))
    max_g = n3 if n3 < 2 else max(1, n3 // 2)
    g = max(1, min(cap1, max_g))
    while n3 % g:
        g -= 1
    return g * tr3, tr3, rp


# ----------------------------------------------------------------------------
# tiny channel-attention glue in plain JAX (review: drop the K2 pallas_call)
# ----------------------------------------------------------------------------
def _channel_attention(mean_u, mean_m, w1, b1, w2, b2):
    k = w1.shape[1]
    pad = (k - 1) // 2
    C = mean_u.shape[1]

    def branch(m, w, b):
        r0 = jnp.pad(m, ((0, 0), (pad, pad)))
        r1 = jnp.pad(m[:, ::-1], ((0, 0), (pad, pad)))   # channel-reversed row
        acc = jnp.full(m.shape, 0.0, jnp.float32) + b[0]
        for j in range(k):                               # tiny static unroll
            acc = acc + w[0, j] * r0[:, j:j + C] + w[1, j] * r1[:, j:j + C]
        return jax.nn.sigmoid(acc)

    at1 = branch(mean_u, w1, b1) * branch(mean_m, w2, b2)
    return jax.nn.sigmoid((at1 - 0.2) * 2.0)


# ----------------------------------------------------------------------------
# wrapper: full NCAM2D forward
# ----------------------------------------------------------------------------
def ncam2d_forward(x, w1, b1, w2, b2, d):
    """NCAM2D forward. x: (B, C, H, W) with H == W; w1/w2: (2, k); b1/b2: (1,)."""
    B, C, H, W = x.shape
    assert H == W, "bsm mask is square; NCAM2D requires H == W"
    R, HW = B * C, H * W
    elem = jnp.dtype(x.dtype).itemsize
    sub = {4: 8, 2: 16, 1: 32}.get(elem, 8)          # sublane pack per dtype

    HWp = -(-HW // 128) * 128                        # lane-dense (no vst.msk)
    tr1, tr3, rp = _plan_tiles(R, HWp * elem, sub)

    x2d = x.reshape(R, HW)
    if rp != R or HWp != HW:
        x2d = jnp.pad(x2d, ((0, rp - R), (0, HWp - HW)))

    # (HWp, 2) reduction matrix: col0 -> mean, col1 -> bsm-masked mean
    mask = _bsm_np(W, d).astype(np.float32).reshape(HW)
    red_np = np.zeros((HWp, 2), np.float32)
    red_np[:HW, 0] = 1.0 / float(HW)
    red_np[:HW, 1] = mask / float(HW)
    red = jnp.asarray(red_np)

    cparams = pltpu.CompilerParams(dimension_semantics=("parallel",),
                                   vmem_limit_bytes=32 * 1024 * 1024)

    # --- K1: both pooled means in one MXU matmul, single (rp, 2) output -----
    pool_cost = pl.CostEstimate(flops=2 * rp * HWp * 2, transcendentals=0,
                                bytes_accessed=rp * HWp * elem + HWp * 2 * 4 + rp * 2 * 4)
    means = pl.pallas_call(
        _pool_kernel,
        out_shape=jax.ShapeDtypeStruct((rp, 2), jnp.float32),
        grid=(rp // tr1,),
        in_specs=[pl.BlockSpec((tr1, HWp), lambda r: (r, 0)),
                  pl.BlockSpec((HWp, 2), lambda r: (0, 0))],   # resident
        out_specs=pl.BlockSpec((tr1, 2), lambda r: (r, 0)),
        compiler_params=cparams,
        cost_estimate=pool_cost,
    )(x2d, red)

    mean_u = means[:R, 0].reshape(B, C)              # avg_pool(out)
    mean_m = means[:R, 1].reshape(B, C)              # avg_pool(ScaleMaskModule(out))

    at = _channel_attention(mean_u, mean_m,
                            w1.astype(jnp.float32), b1.astype(jnp.float32),
                            w2.astype(jnp.float32), b2.astype(jnp.float32))

    # --- K3: out = x * at ----------------------------------------------------
    at2d = at.reshape(R, 1)
    if rp != R:
        at2d = jnp.pad(at2d, ((0, rp - R), (0, 0)))
    scale_cost = pl.CostEstimate(flops=rp * HWp, transcendentals=0,
                                 bytes_accessed=2 * rp * HWp * elem + rp * 4)
    out2d = pl.pallas_call(
        _scale_kernel,
        out_shape=jax.ShapeDtypeStruct((rp, HWp), x.dtype),
        grid=(rp // tr3,),
        in_specs=[pl.BlockSpec((tr3, HWp), lambda r: (r, 0)),
                  pl.BlockSpec((tr3, 1), lambda r: (r, 0))],
        out_specs=pl.BlockSpec((tr3, HWp), lambda r: (r, 0)),
        compiler_params=cparams,
        cost_estimate=scale_cost,
    )(x2d, at2d)

    return out2d[:R, :HW].reshape(B, C, H, W)


# ----------------------------------------------------------------------------
# pure-numpy reference of the full NCAM2D forward (mirrors the PyTorch module)
# ----------------------------------------------------------------------------
def _ncam2d_ref(x, w1, b1, w2, b2, d):
    x = np.asarray(x, np.float32)
    w1 = np.asarray(w1, np.float32); b1 = np.asarray(b1, np.float32)
    w2 = np.asarray(w2, np.float32); b2 = np.asarray(b2, np.float32)
    B, C, H, W = x.shape
    k = w1.shape[1]
    pad = (k - 1) // 2

    mask = _bsm_np(W, d).astype(np.float32)
    xm = x * mask[None, None]
    m_u = x.mean(axis=(2, 3))                        # avg_pool(out)
    m_m = xm.mean(axis=(2, 3))                       # avg_pool(ScaleMaskModule(out))

    def sigmoid(z):
        return 1.0 / (1.0 + np.exp(-z))

    def branch(m, w, b):
        stack = np.stack([m, m[:, ::-1]], axis=1)    # (B, 2, C)
        stackp = np.pad(stack, ((0, 0), (0, 0), (pad, pad)))
        out = np.zeros((B, C), np.float32) + b[0]
        for h in range(2):
            for j in range(k):
                out = out + w[h, j] * stackp[:, h, j:j + C]
        return sigmoid(out)

    at1 = branch(m_u, w1, b1) * branch(m_m, w2, b2)
    at = sigmoid((at1 - 0.2) * 2.0)
    return x * at[:, :, None, None]


if __name__ == "__main__":
    B, C, H, W = 2, 4, 16, 16
    patch_size = W
    d = (patch_size - 1) // 2 - 1                    # ScaleMaskModule's d

    gamma, bconst = 2, 3
    k = int(abs((math.log(C, 2) + bconst) / gamma))  # same formula as NCAM2D
    k = k if k % 2 else k + 1

    key = jax.random.PRNGKey(0)
    kx, kw1, kb1, kw2, kb2 = jax.random.split(key, 5)
    x = jax.random.normal(kx, (B, C, H, W), dtype=jnp.float32)
    w1 = 0.3 * jax.random.normal(kw1, (2, k), dtype=jnp.float32)   # conv1d  weight
    b1 = 0.1 * jax.random.normal(kb1, (1,), dtype=jnp.float32)     # conv1d  bias
    w2 = 0.3 * jax.random.normal(kw2, (2, k), dtype=jnp.float32)   # conv1d1 weight
    b2 = 0.1 * jax.random.normal(kb2, (1,), dtype=jnp.float32)     # conv1d1 bias

    fwd = jax.jit(ncam2d_forward, static_argnames=("d",))
    out = jax.block_until_ready(fwd(x, w1, b1, w2, b2, d=d))

    expected = _ncam2d_ref(x, w1, b1, w2, b2, d)
    np.testing.assert_allclose(np.asarray(out), expected, rtol=1e-4, atol=1e-5)

    print("KERNEL_OK")
</pallas_src>

<mosaic_0001>
module attributes {stable_mosaic.version = 11 : i64} {
  func.func @_pool_kernel(%arg0: i32, %arg1: memref<8x256xf32, #tpu.memory_space<vmem>>, %arg2: memref<256x2xf32, #tpu.memory_space<vmem>>, %arg3: memref<8x2xf32, #tpu.memory_space<vmem>>) attributes {dimension_semantics = [#tpu.dimension_semantics<parallel>], iteration_bounds = array<i64: 1>, scalar_prefetch = 0 : i64, scratch_operands = 0 : i64, tpu.core_type = #tpu.core_type<tc>, window_params = [{transform_indices = @transform_0, window_bounds = array<i64: 8, 256>}, {pipeline_mode = #tpu.pipeline_mode<synchronous>, transform_indices = @transform_1, window_bounds = array<i64: 256, 2>}, {transform_indices = @transform_2, window_bounds = array<i64: 8, 2>}]} {
    %c0 = arith.constant 0 : index
    %c0_0 = arith.constant 0 : index
    %0 = vector.load %arg1[%c0, %c0_0] : memref<8x256xf32, #tpu.memory_space<vmem>>, vector<8x256xf32>
    %c0_1 = arith.constant 0 : index
    %c0_2 = arith.constant 0 : index
    %1 = vector.load %arg2[%c0_1, %c0_2] : memref<256x2xf32, #tpu.memory_space<vmem>>, vector<256x2xf32>
    %cst = arith.constant dense<0.000000e+00> : vector<8x2xf32>
    %2 = tpu.matmul %0, %1, %cst {dimension_numbers = #tpu.dot_dimension_numbers<[1], [0], [0], [1], [0, 0, 1, 1], [], []>} : vector<8x256xf32>, vector<256x2xf32>, vector<8x2xf32> -> vector<8x2xf32>
    %c0_3 = arith.constant 0 : index
    %c0_4 = arith.constant 0 : index
    %3 = vector.load %arg3[%c0_3, %c0_4] : memref<8x2xf32, #tpu.memory_space<vmem>>, vector<8x2xf32>
    tpu.vector_store %arg3[%c0_3, %c0_4], %2 {strides = array<i32>} : memref<8x2xf32, #tpu.memory_space<vmem>>, vector<8x2xf32>,
    return
  }
  func.func @transform_0(%arg0: i32) -> (i32, i32) {
    %c0_i32 = arith.constant 0 : i32
    %c0_i32_0 = arith.constant 0 : i32
    return %arg0, %c0_i32 : i32, i32
  }
  func.func @transform_1(%arg0: i32) -> (i32, i32) {
    %c0_i32 = arith.constant 0 : i32
    %c0_i32_0 = arith.constant 0 : i32
    %c0_i32_1 = arith.constant 0 : i32
    return %c0_i32, %c0_i32_0 : i32, i32
  }
  func.func @transform_2(%arg0: i32) -> (i32, i32) {
    %c0_i32 = arith.constant 0 : i32
    %c0_i32_0 = arith.constant 0 : i32
    return %arg0, %c0_i32 : i32, i32
  }
}

module attributes {stable_mosaic.version = 11 : i64} {
  func.func @_scale_kernel(%arg0: i32, %arg1: memref<8x256xf32, #tpu.memory_space<vmem>>, %arg2: memref<8x1xf32, #tpu.memory_space<vmem>>, %arg3: memref<8x256xf32, #tpu.memory_space<vmem>>) attributes {dimension_semantics = [#tpu.dimension_semantics<parallel>], iteration_bounds = array<i64: 1>, scalar_prefetch = 0 : i64, scratch_operands = 0 : i64, tpu.core_type = #tpu.core_type<tc>, window_params = [{transform_indices = @transform_0, window_bounds = array<i64: 8, 256>}, {transform_indices = @transform_1, window_bounds = array<i64: 8, 1>}, {transform_indices = @transform_2, window_bounds = array<i64: 8, 256>}]} {
    %c0 = arith.constant 0 : index
    %c0_0 = arith.constant 0 : index
    %0 = vector.load %arg1[%c0, %c0_0] : memref<8x256xf32, #tpu.memory_space<vmem>>, vector<8x256xf32>
    %c0_1 = arith.constant 0 : index
    %c0_2 = arith.constant 0 : index
    %1 = vector.load %arg2[%c0_1, %c0_2] : memref<8x1xf32, #tpu.memory_space<vmem>>, vector<8x1xf32>
    %2 = vector.broadcast %1 : vector<8x1xf32> to vector<8x256xf32>
    %3 = arith.mulf %0, %2 : vector<8x256xf32>
    %c0_3 = arith.constant 0 : index
    %c0_4 = arith.constant 0 : index
    %4 = vector.load %arg3[%c0_3, %c0_4] : memref<8x256xf32, #tpu.memory_space<vmem>>, vector<8x256xf32>
    tpu.vector_store %arg3[%c0_3, %c0_4], %3 {strides = array<i32>} : memref<8x256xf32, #tpu.memory_space<vmem>>, vector<8x256xf32>,
    return
  }
  func.func @transform_0(%arg0: i32) -> (i32, i32) {
    %c0_i32 = arith.constant 0 : i32
    %c0_i32_0 = arith.constant 0 : i32
    return %arg0, %c0_i32 : i32, i32
  }
  func.func @transform_1(%arg0: i32) -> (i32, i32) {
    %c0_i32 = arith.constant 0 : i32
    %c0_i32_0 = arith.constant 0 : i32
    return %arg0, %c0_i32 : i32, i32
  }
  func.func @transform_2(%arg0: i32) -> (i32, i32) {
    %c0_i32 = arith.constant 0 : i32
    %c0_i32_0 = arith.constant 0 : i32
    return %arg0, %c0_i32 : i32, i32
  }
}

</mosaic_0001>

<bundles_post_ra>
// kernel: squeeze.16
= control target key start
LH: loop header
LB: loop body
LE: loop exit
PB: predicated region body
PF: predicated region fallthrough
CT: control target
= control target key end

     0   :  { %vm7_vm0 = vcmask 31744   ;;  %s39_s0 = inlined_call_operand.vmem [shape: f32[8], index: 0, kind: input, shape index: {}]   ;;  %s40_s1 = inlined_call_operand.vmem [shape: f32[2,4], index: 1, kind: output, shape index: {}]  }
   0x1   :  { %v4_v0 = vld [vmem:[%s39_s0] sm:$0x1]  ;;  %s22_s0 = smov 124  }
   0x2   :  { %5 = vst [vmem:[#allocation1] sm:$0x1] %v4_v0 }
   0x9   :  { %v9_v1 = vld [vmem:[#allocation1] sm:$0x1]  }
   0xa   :  { %v6_v2 = vld [vmem:[#allocation1] sm:$0x1]   ;;  %10 = vrot.lane.b32.xlu0 %v9_v1, %s22_s0 }
   0xb   :  { %8 = vst.msk [vmem:[#allocation0] sm:$0x1] %vm7_vm0, %v6_v2  }
  0x7c   :  { %v11_v3 = vpop.permute.xlu0 %10  }
  0x7d   :  { %14 = vst.msk [vmem:[#allocation0 + $0x1] sm:$0x1] %vm7_vm0, %v11_v3  }
  0x84   :  { %v17_v4 = vld [vmem:[#allocation0] sm:$0x3] }
  0x85   :  { %20 = vst [vmem:[%s40_s1] sm:$0x3] %v17_v4 }

// kernel: ncam2d_forward.2
= control target key start
LH: loop header
LB: loop body
LE: loop exit
PB: predicated region body
PF: predicated region fallthrough
CT: control target
= control target key end

     0   :  { %7 = vsyncpa [#allocation3], 0  ;;  %s137_s12 = smov [#allocation2]   ;;  %s138_s14 = smov 128   ;;  %s167_s0 = inlined_call_operand.vmem [shape: f32[8,256], index: 0, kind: input, shape index: {}]   ;;  %s168_s1 = inlined_call_operand.hbm [shape: f32[256,2], index: 1, kind: input, shape index: {}]   ;;  %s169_s2 = inlined_call_operand.vmem [shape: f32[8,2], index: 2, kind: output, shape index: {}]  }
   0x1   :  { %s14_s11 = sshll.u32 %s168_s1, 4  ;;  %s16_s13 = sshll.u32 %s137_s12, 4  ;;  %s15_s11 = int_to_ptr.hbm [resolvable:$true] %s14_s11  ;;  %s17_s13 = int_to_ptr.vmem [resolvable:$true] %s16_s13 }
   0x2   :  { %s139_s15 = smov 8  }
   0x3   :  { %22 = dma.hbm_to_vmem [thread:$0]  %s15_s11, 4096, %s17_s13, [#allocation3], %s138_s14, %s138_s14, %s139_s15  }
   0x4   :  { %135 = dma.done.wait [#allocation3], 4096  }
   0x5   :  { %136 = vsyncadd [#allocation3], 4294963200  ;;  %v44_v0 = vld [vmem:[#allocation2 + $0x78] sm:$0xff]  ;;  %v43_v2 = vld [vmem:[#allocation2 + $0x70] sm:$0xff]  ;;  %vm101_vm0 = vcmask 15360  }
   0x6   :  { %v60_v1 = vld [vmem:[#allocation2 + $0xf8] sm:$0xff]  ;;  %61 = vmatpush.msra.mxu0 %v44_v0  ;;  %v59_v3 = vld [vmem:[#allocation2 + $0xf0] sm:$0xff]  ;;  %v42_v4 = vld [vmem:[#allocation2 + $0x68] sm:$0xff] }
   0x7   :  { %81 = vmatpush.msra.mxu1 %v60_v1  ;;  %v58_v5 = vld [vmem:[#allocation2 + $0xe8] sm:$0xff]  ;;  %v41_v6 = vld [vmem:[#allocation2 + $0x60] sm:$0xff]  ;;  %v40_v8 = vld [vmem:[#allocation2 + $0x58] sm:$0xff] }
   0x8   :  { %62 = vmatpush.msra.mxu0 %v43_v2  ;;  %v57_v7 = vld [vmem:[#allocation2 + $0xe0] sm:$0xff]  ;;  %v56_v9 = vld [vmem:[#allocation2 + $0xd8] sm:$0xff]  ;;  %v39_v10 = vld [vmem:[#allocation2 + $0x50] sm:$0xff] }
   0x9   :  { %82 = vmatpush.msra.mxu1 %v59_v3  ;;  %v55_v11 = vld [vmem:[#allocation2 + $0xd0] sm:$0xff]  ;;  %v38_v12 = vld [vmem:[#allocation2 + $0x48] sm:$0xff]  ;;  %v37_v14 = vld [vmem:[#allocation2 + $0x40] sm:$0xff] }
   0xa   :  { %63 = vmatpush.msra.mxu0 %v42_v4  ;;  %v54_v13 = vld [vmem:[#allocation2 + $0xc8] sm:$0xff]  ;;  %v53_v15 = vld [vmem:[#allocation2 + $0xc0] sm:$0xff]  ;;  %v36_v16 = vld [vmem:[#allocation2 + $0x38] sm:$0xff] }
   0xb   :  { %83 = vmatpush.msra.mxu1 %v58_v5  ;;  %v52_v17 = vld [vmem:[#allocation2 + $0xb8] sm:$0xff]  ;;  %v35_v18 = vld [vmem:[#allocation2 + $0x30] sm:$0xff]  ;;  %v34_v20 = vld [vmem:[#allocation2 + $0x28] sm:$0xff] }
   0xc   :  { %64 = vmatpush.msra.mxu0 %v41_v6  ;;  %v51_v19 = vld [vmem:[#allocation2 + $0xb0] sm:$0xff]  ;;  %v50_v21 = vld [vmem:[#allocation2 + $0xa8] sm:$0xff]  ;;  %v33_v22 = vld [vmem:[#allocation2 + $0x20] sm:$0xff] }
   0xd   :  { %84 = vmatpush.msra.mxu1 %v57_v7  ;;  %v49_v23 = vld [vmem:[#allocation2 + $0xa0] sm:$0xff]  ;;  %v32_v24 = vld [vmem:[#allocation2 + $0x18] sm:$0xff]  ;;  %v31_v26 = vld [vmem:[#allocation2 + $0x10] sm:$0xff] }
   0xe   :  { %65 = vmatpush.msra.mxu0 %v40_v8  ;;  %v48_v25 = vld [vmem:[#allocation2 + $0x98] sm:$0xff]  ;;  %v47_v27 = vld [vmem:[#allocation2 + $0x90] sm:$0xff]  ;;  %v30_v28 = vld [vmem:[#allocation2 + $0x8] sm:$0xff] }
   0xf   :  { %85 = vmatpush.msra.mxu1 %v56_v9  ;;  %v46_v29 = vld [vmem:[#allocation2 + $0x88] sm:$0xff]  ;;  %v29_v30 = vld [vmem:[#allocation2] sm:$0xff] }
  0x10   :  { %66 = vmatpush.msra.mxu0 %v39_v10  ;;  %v45_v31 = vld [vmem:[#allocation2 + $0x80] sm:$0xff]  ;;  %v28_v33 = vld [vmem:[%s167_s0 + $0x8] sm:$0xff] }
  0x11   :  { %86 = vmatpush.msra.mxu1 %v55_v11  ;;  %v27_v32 = vld [vmem:[%s167_s0] sm:$0xff] }
  0x12   :  { %67 = vmatpush.msra.mxu0 %v38_v12 }
  0x13   :  { %87 = vmatpush.msra.mxu1 %v54_v13 }
  0x14   :  { %68 = vmatpush.msra.mxu0 %v37_v14 }
  0x15   :  { %88 = vmatpush.msra.mxu1 %v53_v15 }
  0x16   :  { %69 = vmatpush.msra.mxu0 %v36_v16 }
  0x17   :  { %89 = vmatpush.msra.mxu1 %v52_v17 }
  0x18   :  { %70 = vmatpush.msra.mxu0 %v35_v18 }
  0x19   :  { %90 = vmatpush.msra.mxu1 %v51_v19 }
  0x1a   :  { %71 = vmatpush.msra.mxu0 %v34_v20 }
  0x1b   :  { %91 = vmatpush.msra.mxu1 %v50_v21 }
  0x1c   :  { %72 = vmatpush.msra.mxu0 %v33_v22 }
  0x1d   :  { %92 = vmatpush.msra.mxu1 %v49_v23 }
  0x1e   :  { %73 = vmatpush.msra.mxu0 %v32_v24 }
  0x1f   :  { %93 = vmatpush.msra.mxu1 %v48_v25 }
  0x20   :  { %74 = vmatpush.msra.mxu0 %v31_v26 }
  0x21   :  { %94 = vmatpush.msra.mxu1 %v47_v27 }
  0x22   :  { %75 = vmatpush.msra.mxu0 %v30_v28 }
  0x23   :  { %95 = vmatpush.msra.mxu1 %v46_v29 }
  0x24   :  { %76 = vmatpush.msra.mxu0 %v29_v30 }
  0x25   :  { %96 = vmatpush.msra.mxu1 %v45_v31  ;;  %77 = vmatmul.f32.vlgmr.msra.gmra.mxu0 %v27_v32 }
  0x26   :  { %97 = vmatmul.f32.vlgmr.msra.gmra.mxu1 %v28_v33 }
  0xa2   :  { %v78_v34 = vpop.f32.mrf.mxu0 }
  0xa3   :  { %v98_v35 = vpop.f32.mrf.mxu1 }
  0xa4   :  { %v99_v36 = vadd.f32 %v98_v35, %v78_v34 }
  0xa6   :  { %102 = vst.msk [vmem:[%s169_s2] sm:$0xff] %vm101_vm0, %v99_v36 }
  0xa7   :  { %107 = vsyncpa [#allocation3], 1 }

// kernel: ncam2d_forward.3
= control target key start
LH: loop header
LB: loop body
LE: loop exit
PB: predicated region body
PF: predicated region fallthrough
CT: control target
= control target key end

     0   :  { %v29_v0 = vmov 0   ;;  %s60_s1 = inlined_call_operand.vmem [shape: f32[8,1], index: 1, kind: input, shape index: {}]   ;;  %s61_s0 = inlined_call_operand.vmem [shape: f32[8,256], index: 0, kind: input, shape index: {}]   ;;  %s62_s2 = inlined_call_operand.vmem [shape: f32[8,256], index: 2, kind: output, shape index: {}]  }
   0x1   :  { %28 = vset.pattern.permute.xlu0 %v29_v0  ;;  %v13_v1 = vld [vmem:[%s60_s1] sm:$0xff]  ;;  %v12_v3 = vld [vmem:[%s61_s0 + $0x8] sm:$0xff] }
   0x2   :  { %16 = vperm.xlu0 %28, %v13_v1   ;;  %v11_v2 = vld [vmem:[%s61_s0] sm:$0xff] }
  0x74   :  { %v17_v4 = vpop.permute.xlu0 %16 }
  0x75   :  { %v19_v5 = vmul.f32 %v17_v4, %v11_v2  ;;  %v20_v6 = vmul.f32 %v17_v4, %v12_v3 }
  0x77   :  { %21 = vst [vmem:[%s62_s2] sm:$0xff] %v19_v5 }
  0x78   :  { %22 = vst [vmem:[%s62_s2 + $0x8] sm:$0xff] %v20_v6 }

</bundles_post_ra>
